<compile_context>
chip_gen: v7x
topology: tpu7x:2x2x1
jax: 0.10.0
libtpu: 0.0.40
codegen_flags: <defaults>
</compile_context>

<pallas_src>
import functools
import math

import jax
import jax.numpy as jnp
from jax import lax
from jax.experimental import pallas as pl
from jax.experimental.pallas import tpu as pltpu


def _round_up(x: int, m: int) -> int:
    return ((x + m - 1) // m) * m


def _vmem_capacity_bytes() -> int:
    """Per-core VMEM capacity (64 MiB on v7x, 128 MiB on v5e/v6e)."""
    try:
        return int(pltpu.get_tpu_info().vmem_capacity_bytes)
    except Exception:  # not on a real TPU (e.g. interpret mode); be conservative
        return 64 * 1024 * 1024


def _plan_row_tiles(batch: int, dim: int, vmem_cap: int) -> tuple[int, int]:
    """(tq, batch_pad): pass-2 query-row tile and the padded per-half batch."""
    if batch <= 256:
        return batch, batch                      # single tile, no padding needed
    budget = int(0.55 * vmem_cap)
    for tq in (256, 128):                        # 256 feeds the 256-deep MXU (v6e/v7x)
        batch_pad = _round_up(batch, tq)
        resident = 4 * batch_pad * dim           # two bf16 halves, single-buffered
        temps = 40 * tq * batch_pad + 24 * tq * dim
        if resident + temps <= budget:
            return tq, batch_pad
    # TODO(synk): column-blocked online LSE would make pass-2 VMEM independent of B.
    return 128, _round_up(batch, 128)


def _pick_norm_tile(batch_pad: int, dim: int) -> int:
    """Pass 1 is HBM-bound: biggest row tile that divides batch_pad and fits VMEM."""
    budget = 24 * 1024 * 1024                    # (2 f32 in + 2 bf16 out) x 2 buffers
    for tr in (1024, 512, 256, 128):
        if batch_pad % tr == 0 and 24 * tr * dim <= budget:
            return tr
    if batch_pad % 128 == 0:
        return 128
    return batch_pad


def _normalize_kernel(zi_ref, zj_ref, zhi_ref, zhj_ref, *, inv_sqrt_temp):
    """zhat = z / max(||z||, 1e-8) * (1/sqrt(T)), stored bf16.

    zhat_a . zhat_b == cos_sim(a, b) / T with torch's per-operand eps clamp.
    All math in f32 (VPU/EUP); only the final store narrows to bf16.
    """
    for src, dst in ((zi_ref, zhi_ref), (zj_ref, zhj_ref)):
        x = src[...].astype(jnp.float32)
        ssq = jnp.sum(x * x, axis=-1, keepdims=True)
        # rsqrt(max(||x||^2, 1e-16)) == 1 / max(||x||, 1e-8)   (EUP, no divide)
        inv = inv_sqrt_temp * lax.rsqrt(jnp.maximum(ssq, 1e-16))
        dst[...] = (x * inv).astype(dst.dtype)


def _loss_kernel(zhi_ref, zhj_ref, out_ref, *, batch, batch_pad, tq):
    """Per-row CE for global rows [B + t*tq, B + (t+1)*tq) (the z_j half only)."""
    t = pl.program_id(0)
    lstart = pl.multiple_of(t * tq, tq)

    lhs = zhj_ref[pl.ds(lstart, tq), :]          # (tq, D) bf16, 1/sqrt(T) folded in
    partner = zhi_ref[pl.ds(lstart, tq), :]      # positive pairs (same local rows)

    # (tq, B_pad) similarity slabs against both resident halves.  Contraction
    # on dim 1 of both operands -> no relayout; bf16 MXU, f32 accumulation.
    dn = (((1,), (1,)), ((), ()))
    sim_i = lax.dot_general(lhs, zhi_ref[...], dn,
                            preferred_element_type=jnp.float32)
    sim_j = lax.dot_general(lhs, zhj_ref[...], dn,
                            preferred_element_type=jnp.float32)

    col = lax.broadcasted_iota(jnp.int32, (tq, batch_pad), 1)
    row = lax.broadcasted_iota(jnp.int32, (tq, 1), 0) + lstart
    # fill_diagonal_(-inf): for global row B+r the diagonal lands in the z_j
    # column half at local column r.  (It can never land in sim_i for these
    # rows, so that mask is dropped.)
    sim_j = jnp.where(col == row, float("-inf"), sim_j)
    if batch_pad != batch:                       # kill padded columns
        sim_i = jnp.where(col >= batch, float("-inf"), sim_i)
        sim_j = jnp.where(col >= batch, float("-inf"), sim_j)

    # Target logit sim[B+r, r] = <zhat_j[r], zhat_i[r]> as an O(tq*D) row dot.
    tgt = jnp.sum(lhs.astype(jnp.float32) * partner.astype(jnp.float32),
                  axis=-1, keepdims=True)

    # Row-wise logsumexp across both column halves (all f32 elementwise).
    m = jnp.maximum(jnp.max(sim_i, axis=-1, keepdims=True),
                    jnp.max(sim_j, axis=-1, keepdims=True))
    s = (jnp.sum(jnp.exp(sim_i - m), axis=-1, keepdims=True) +
         jnp.sum(jnp.exp(sim_j - m), axis=-1, keepdims=True))
    lse = m + jnp.log(s)

    out_ref[...] = (lse - tgt).reshape(1, tq, 1)


def contrastive_per_row_loss(z_i, z_j, temperature=0.07):
    """Per-row cross entropy of the masked (2B,2B) similarity matrix."""
    assert z_i.shape == z_j.shape and z_i.ndim == 2
    batch, dim = z_i.shape
    vmem_cap = _vmem_capacity_bytes()
    tq, batch_pad = _plan_row_tiles(batch, dim, vmem_cap)
    if batch_pad != batch:                       # pad awkward sizes, drop rows later
        pad = ((0, batch_pad - batch), (0, 0))
        z_i = jnp.pad(z_i, pad)
        z_j = jnp.pad(z_j, pad)

    # ---- Pass 1: row-normalize, fold 1/sqrt(T), store bf16 residents. ----
    tr = _pick_norm_tile(batch_pad, dim)
    zhat_i, zhat_j = pl.pallas_call(
        functools.partial(_normalize_kernel,
                          inv_sqrt_temp=1.0 / math.sqrt(float(temperature))),
        out_shape=(jax.ShapeDtypeStruct((batch_pad, dim), jnp.bfloat16),
                   jax.ShapeDtypeStruct((batch_pad, dim), jnp.bfloat16)),
        grid_spec=pltpu.PrefetchScalarGridSpec(
            num_scalar_prefetch=0,
            grid=(batch_pad // tr,),
            in_specs=[pl.BlockSpec((tr, dim), lambda t: (t, 0)),
                      pl.BlockSpec((tr, dim), lambda t: (t, 0))],
            out_specs=[pl.BlockSpec((tr, dim), lambda t: (t, 0)),
                       pl.BlockSpec((tr, dim), lambda t: (t, 0))]),
        compiler_params=pltpu.CompilerParams(
            dimension_semantics=("parallel",)),
    )(z_i, z_j)

    # ---- Pass 2: tiled CE for the z_j rows; both halves stay VMEM-resident. ----
    tiles = batch_pad // tq
    resident = 4 * batch_pad * dim               # two bf16 halves (single-buffered)
    temps = 40 * tq * batch_pad + 24 * tq * dim
    est = 2 * resident + temps + (2 << 20)       # slack in case Buffered(1) is ignored
    vmem_limit = int(max(32 * 1024 * 1024, min(est, int(0.85 * vmem_cap))))

    per_row_j = pl.pallas_call(
        functools.partial(_loss_kernel, batch=batch, batch_pad=batch_pad, tq=tq),
        out_shape=jax.ShapeDtypeStruct((tiles, tq, 1), jnp.float32),
        grid_spec=pltpu.PrefetchScalarGridSpec(
            num_scalar_prefetch=0,
            grid=(tiles,),
            in_specs=[
                pl.BlockSpec((batch_pad, dim), lambda t: (0, 0),
                             pipeline_mode=pl.Buffered(1)),
                pl.BlockSpec((batch_pad, dim), lambda t: (0, 0),
                             pipeline_mode=pl.Buffered(1)),
            ],
            out_specs=pl.BlockSpec((1, tq, 1), lambda t: (t, 0, 0))),
        compiler_params=pltpu.CompilerParams(
            dimension_semantics=("parallel",),
            vmem_limit_bytes=vmem_limit),
    )(zhat_i, zhat_j)

    per_row_j = per_row_j.reshape(batch_pad)[:batch]
    # Rows [0,B) target the -inf'd diagonal -> +inf for every finite input.
    per_row_i = jnp.full((batch,), jnp.inf, dtype=jnp.float32)
    return jnp.concatenate([per_row_i, per_row_j])


def contrastive_loss(z_i, z_j, temperature=0.07):
    """Pallas equivalent of ContrastiveLoss(temperature)(z_i, z_j)."""
    per_row = contrastive_per_row_loss(z_i, z_j, temperature)
    # mean over all 2B rows == (loss_i + loss_j) / 2  (== +inf, as in the module)
    return jnp.sum(per_row) / per_row.shape[0]


if __name__ == "__main__":
    key = jax.random.PRNGKey(0)
    k_i, k_j = jax.random.split(key)
    B, D = 8, 32
    z_i = jax.random.normal(k_i, (B, D), dtype=jnp.float32)
    z_j = jax.random.normal(k_j, (B, D), dtype=jnp.float32)
    temperature = 0.07

    per_row = jax.block_until_ready(contrastive_per_row_loss(z_i, z_j, temperature))
    loss = jax.block_until_ready(contrastive_loss(z_i, z_j, temperature))

    # ---- Reference 1: exact torch mirror, f32 / HIGHEST precision. ----
    z = jnp.concatenate([z_i, z_j], axis=0)
    n = 2 * B
    nrm = jnp.sqrt(jnp.sum(z * z, axis=-1))
    denom = jnp.maximum(nrm[:, None] * nrm[None, :], 1e-8)
    sim = jnp.dot(z, z.T, precision=lax.Precision.HIGHEST) / denom / temperature
    sim = jnp.where(jnp.eye(n, dtype=bool), -jnp.inf, sim)
    lse = jax.nn.logsumexp(sim, axis=-1)
    labels = jnp.arange(B)
    tgt = jnp.concatenate([sim[jnp.arange(B), labels],
                           sim[jnp.arange(B, n), labels]])
    per_row_f32 = lse - tgt

    # ---- Reference 2: same math but with the bf16 operands the MXU sees. ----
    zh = ((z / jnp.maximum(nrm, 1e-8)[:, None]) *
          (1.0 / math.sqrt(temperature))).astype(jnp.bfloat16)
    sim_bf = lax.dot_general(zh, zh, (((1,), (1,)), ((), ())),
                             preferred_element_type=jnp.float32)
    sim_bf = jnp.where(jnp.eye(n, dtype=bool), -jnp.inf, sim_bf)
    lse_bf = jax.nn.logsumexp(sim_bf, axis=-1)
    tgt_bf = jnp.concatenate([sim_bf[jnp.arange(B), labels],
                              sim_bf[jnp.arange(B, n), labels]])
    per_row_bf = lse_bf - tgt_bf

    # Rows [0,B) target the masked diagonal -> +inf (faithful to the module).
    assert per_row.shape == (2 * B,)
    assert bool(jnp.all(jnp.isposinf(per_row[:B])))
    assert bool(jnp.all(jnp.isposinf(per_row_f32[:B])))
    assert bool(jnp.isposinf(loss))
    # Finite half: tight match vs the bf16-operand reference, loose vs pure f32.
    assert bool(jnp.allclose(per_row[B:], per_row_bf[B:], rtol=5e-3, atol=5e-3))
    assert bool(jnp.allclose(per_row[B:], per_row_f32[B:], rtol=5e-2, atol=5e-2))

    print("KERNEL_OK")
</pallas_src>

<mosaic_0001>
module attributes {stable_mosaic.version = 11 : i64} {
  func.func @_normalize_kernel(%arg0: i32, %arg1: memref<8x32xf32, #tpu.memory_space<vmem>>, %arg2: memref<8x32xf32, #tpu.memory_space<vmem>>, %arg3: memref<8x32xbf16, #tpu.memory_space<vmem>>, %arg4: memref<8x32xbf16, #tpu.memory_space<vmem>>) attributes {dimension_semantics = [#tpu.dimension_semantics<parallel>], iteration_bounds = array<i64: 1>, scalar_prefetch = 0 : i64, scratch_operands = 0 : i64, tpu.core_type = #tpu.core_type<tc>, window_params = [{transform_indices = @transform_0, window_bounds = array<i64: 8, 32>}, {transform_indices = @transform_1, window_bounds = array<i64: 8, 32>}, {transform_indices = @transform_2, window_bounds = array<i64: 8, 32>}, {transform_indices = @transform_3, window_bounds = array<i64: 8, 32>}]} {
    %c0 = arith.constant 0 : index
    %c0_0 = arith.constant 0 : index
    %0 = vector.load %arg1[%c0, %c0_0] : memref<8x32xf32, #tpu.memory_space<vmem>>, vector<8x32xf32>
    %1 = arith.mulf %0, %0 : vector<8x32xf32>
    %cst = arith.constant dense<0.000000e+00> : vector<8xf32>
    %2 = vector.multi_reduction <add>, %1, %cst [1] : vector<8x32xf32> to vector<8xf32>
    %3 = vector.shape_cast %2 : vector<8xf32> to vector<8x1xf32>
    %cst_1 = arith.constant 1.000000e-16 : f32
    %4 = vector.broadcast %cst_1 : f32 to vector<8x1xf32>
    %5 = arith.maximumf %3, %4 : vector<8x1xf32>
    %6 = math.rsqrt %5 : vector<8x1xf32>
    %cst_2 = arith.constant 3.77964473 : f32
    %7 = vector.broadcast %cst_2 : f32 to vector<8x1xf32>
    %8 = arith.mulf %7, %6 : vector<8x1xf32>
    %9 = vector.broadcast %8 : vector<8x1xf32> to vector<8x32xf32>
    %10 = arith.mulf %0, %9 : vector<8x32xf32>
    %11 = arith.truncf %10 : vector<8x32xf32> to vector<8x32xbf16>
    %c0_3 = arith.constant 0 : index
    %c0_4 = arith.constant 0 : index
    %12 = vector.load %arg3[%c0_3, %c0_4] : memref<8x32xbf16, #tpu.memory_space<vmem>>, vector<8x32xbf16>
    tpu.vector_store %arg3[%c0_3, %c0_4], %11 {strides = array<i32>} : memref<8x32xbf16, #tpu.memory_space<vmem>>, vector<8x32xbf16>,
    %c0_5 = arith.constant 0 : index
    %c0_6 = arith.constant 0 : index
    %13 = vector.load %arg2[%c0_5, %c0_6] : memref<8x32xf32, #tpu.memory_space<vmem>>, vector<8x32xf32>
    %14 = arith.mulf %13, %13 : vector<8x32xf32>
    %cst_7 = arith.constant dense<0.000000e+00> : vector<8xf32>
    %15 = vector.multi_reduction <add>, %14, %cst_7 [1] : vector<8x32xf32> to vector<8xf32>
    %16 = vector.shape_cast %15 : vector<8xf32> to vector<8x1xf32>
    %cst_8 = arith.constant 1.000000e-16 : f32
    %17 = vector.broadcast %cst_8 : f32 to vector<8x1xf32>
    %18 = arith.maximumf %16, %17 : vector<8x1xf32>
    %19 = math.rsqrt %18 : vector<8x1xf32>
    %cst_9 = arith.constant 3.77964473 : f32
    %20 = vector.broadcast %cst_9 : f32 to vector<8x1xf32>
    %21 = arith.mulf %20, %19 : vector<8x1xf32>
    %22 = vector.broadcast %21 : vector<8x1xf32> to vector<8x32xf32>
    %23 = arith.mulf %13, %22 : vector<8x32xf32>
    %24 = arith.truncf %23 : vector<8x32xf32> to vector<8x32xbf16>
    %c0_10 = arith.constant 0 : index
    %c0_11 = arith.constant 0 : index
    %25 = vector.load %arg4[%c0_10, %c0_11] : memref<8x32xbf16, #tpu.memory_space<vmem>>, vector<8x32xbf16>
    tpu.vector_store %arg4[%c0_10, %c0_11], %24 {strides = array<i32>} : memref<8x32xbf16, #tpu.memory_space<vmem>>, vector<8x32xbf16>,
    return
  }
  func.func @transform_0(%arg0: i32) -> (i32, i32) {
    %c0_i32 = arith.constant 0 : i32
    %c0_i32_0 = arith.constant 0 : i32
    return %arg0, %c0_i32 : i32, i32
  }
  func.func @transform_1(%arg0: i32) -> (i32, i32) {
    %c0_i32 = arith.constant 0 : i32
    %c0_i32_0 = arith.constant 0 : i32
    return %arg0, %c0_i32 : i32, i32
  }
  func.func @transform_2(%arg0: i32) -> (i32, i32) {
    %c0_i32 = arith.constant 0 : i32
    %c0_i32_0 = arith.constant 0 : i32
    return %arg0, %c0_i32 : i32, i32
  }
  func.func @transform_3(%arg0: i32) -> (i32, i32) {
    %c0_i32 = arith.constant 0 : i32
    %c0_i32_0 = arith.constant 0 : i32
    return %arg0, %c0_i32 : i32, i32
  }
}

</mosaic_0001>

<bundles_post_ra>
// kernel: tpu_custom_call.1
= control target key start
LH: loop header
LB: loop body
LE: loop exit
PB: predicated region body
PF: predicated region fallthrough
CT: control target
= control target key end

     0   :  { %9 = vsyncpa [#allocation3], 0  ;;  %s271_s0 = inlined_call_operand.hbm [shape: f32[8,32], index: 0, kind: input, shape index: {}]   ;;  %s272_s1 = inlined_call_operand.hbm [shape: f32[8,32], index: 1, kind: input, shape index: {}]   ;;  %s273_s2 = inlined_call_operand.hbm [shape: bf16[8,32], index: 2, kind: output, shape index: {0}]   ;;  %s274_s3 = inlined_call_operand.hbm [shape: bf16[8,32], index: 3, kind: output, shape index: {1}]  }
   0x1   :  { %10 = vsyncpa [#allocation6], 0 }
   0x2   :  { %11 = vsyncpa [#allocation4], 0 }
   0x3   :  { %12 = vsyncpa [#allocation9], 0  ;;  %s197_s12 = smov [#allocation2]   ;;  %s198_s14 = smov [#allocation5]  }
   0x4   :  { %s19_s13 = sshll.u32 %s197_s12, 4  ;;  %s29_s15 = sshll.u32 %s198_s14, 4  ;;  %s20_s13 = int_to_ptr.vmem [resolvable:$true] %s19_s13  ;;  %s30_s15 = int_to_ptr.vmem [resolvable:$true] %s29_s15 }
   0x5   :  { %s101_s18 = scalar_lea.hbm %s271_s0, 128 }
   0x6   :  { %p102_p0 = scmp.ne.s32.totalorder %s271_s0, %s101_s18  ;;  %p105_p1 = scmp.lt.u32.totalorder %s101_s18, %s271_s0 }
   0x8   :  { %p107_p2 = pnand %p105_p1, %p102_p0 }
   0xa   :  { %110 = shalt.err (!%p107_p2)
}
   0xb   :  { %s111_s23 = scalar_lea.vmem %s20_s13, 128  ;;  %p116_p4 = scmp.lt.s32.totalorder %s20_s13, %s20_s13 }
   0xc   :  { %p112_p3 = scmp.ne.s32.totalorder %s20_s13, %s111_s23  ;;  %p117_p5 = scmp.lt.s32.totalorder %s111_s23, %s111_s23 }
   0xe   :  { %p118_p6 = por %p117_p5, %p116_p4 }
  0x10   :  { %p119_p7 = pnand %p118_p6, %p112_p3 }
  0x12   :  { %122 = shalt.err (!%p119_p7)
}
  0x13   :  { %22 = dma.hbm_to_vmem [thread:$0]  %s271_s0, 128, %s20_s13, [#allocation3]  }
  0x14   :  { %s123_s28 = scalar_lea.hbm %s272_s1, 128 }
  0x15   :  { %p124_p8 = scmp.ne.s32.totalorder %s272_s1, %s123_s28  ;;  %p127_p9 = scmp.lt.u32.totalorder %s123_s28, %s272_s1 }
  0x17   :  { %p129_p10 = pnand %p127_p9, %p124_p8 }
  0x19   :  { %132 = shalt.err (!%p129_p10)
}
  0x1a   :  { %s133_s6 = scalar_lea.vmem %s30_s15, 128  ;;  %p138_p12 = scmp.lt.s32.totalorder %s30_s15, %s30_s15 }
  0x1b   :  { %p134_p11 = scmp.ne.s32.totalorder %s30_s15, %s133_s6  ;;  %p139_p13 = scmp.lt.s32.totalorder %s133_s6, %s133_s6 }
  0x1d   :  { %p140_p0 = por %p139_p13, %p138_p12 }
  0x1f   :  { %p141_p1 = pnand %p140_p0, %p134_p11 }
  0x21   :  { %144 = shalt.err (!%p141_p1)
}
  0x22   :  { %32 = dma.hbm_to_vmem [thread:$0]  %s272_s1, 128, %s30_s15, [#allocation6]  }
  0x23   :  { %189 = dma.done.wait [#allocation3], 128  }
  0x24   :  { %190 = vsyncadd [#allocation3], 4294967168 }
  0x25   :  { %191 = dma.done.wait [#allocation6], 128  }
  0x26   :  { %192 = vsyncadd [#allocation6], 4294967168  ;;  %v39_v0 = vld [vmem:[#allocation2] sm:$0xff]  ;;  %vm41_vm0 = vcmask 261120   ;;  %v52_v1 = vld [vmem:[#allocation5] sm:$0xff]  ;;  %s199_s1 = smov [#allocation7]  }
  0x27   :  { %v40_v2 = vmul.f32 %v39_v0, %v39_v0  ;;  %v53_v3 = vmul.f32 %v52_v1, %v52_v1  ;;  %s69_s8 = sshll.u32 %s199_s1, 4  ;;  %vm50_vm1 = vcmask 257024   ;;  %s200_s9 = smov [#allocation8]   ;;  %s70_s8 = int_to_ptr.vmem [resolvable:$true] %s69_s8 }
  0x28   :  { %s79_s10 = sshll.u32 %s200_s9, 4  ;;  %s145_s11 = scalar_lea.vmem %s70_s8, 64  ;;  %s80_s10 = int_to_ptr.vmem [resolvable:$true] %s79_s10 }
  0x29   :  { %v42_v4 = vsel %vm41_vm0, %v40_v2, 0.0  ;;  %v54_v5 = vsel %vm41_vm0, %v53_v3, 0.0  ;;  %p146_p2 = scmp.ne.s32.totalorder %s70_s8, %s145_s11  ;;  %p150_p3 = scmp.lt.s32.totalorder %s70_s8, %s70_s8 }
  0x2a   :  { %43 = vadd.xlane.f32.xlu0 %v42_v4  ;;  %p151_p4 = scmp.lt.s32.totalorder %s145_s11, %s145_s11 }
  0x2c   :  { %p152_p5 = por %p151_p4, %p150_p3 }
  0x2e   :  { %55 = vadd.xlane.f32.xlu0 %v54_v5  ;;  %p153_p6 = pnand %p152_p5, %p146_p2 }
  0xb7   :  { %v44_v6 = vpop.xlane.xlu0 %43 }
  0xb8   :  { %v45_v7 = vmax.f32 %v44_v6, 1e-16 }
  0xba   :  { %97 = vrsqrt.f32 %v45_v7 }
  0xbb   :  { %v56_v8 = vpop.xlane.xlu0 %55 }
  0xbc   :  { %v57_v9 = vmax.f32 %v56_v8, 1e-16 }
  0xbe   :  { %99 = vrsqrt.f32 %v57_v9 }
  0xc4   :  { %v98_v10 = vpop.eup %97 }
  0xc5   :  { %v47_v11 = vmul.f32 3.7796447, %v98_v10 }
  0xc7   :  { %v48_v12 = vmul.f32 %v47_v11, %v39_v0 }
  0xc8   :  { %v100_v13 = vpop.eup %99 }
  0xc9   :  { %v59_v14 = vmul.f32 3.7796447, %v100_v13  ;;  %v49_v15 = vpack.c.bf16 %v48_v12, %v48_v12 }
  0xcb   :  { %v60_v16 = vmul.f32 %v59_v14, %v52_v1  ;;  %51 = vst.msk [vmem:[#allocation7] sm:$0xf] %vm50_vm1, %v49_v15 }
  0xcc   :  { %156 = shalt.err (!%p153_p6)
}
  0xcd   :  { %s157_s14 = scalar_lea.hbm %s273_s2, 64 }
  0xce   :  { %p158_p7 = scmp.ne.s32.totalorder %s273_s2, %s157_s14  ;;  %p161_p8 = scmp.lt.u32.totalorder %s157_s14, %s273_s2 }
  0xd0   :  { %p163_p9 = pnand %p161_p8, %p158_p7 }
  0xd2   :  { %166 = shalt.err (!%p163_p9)
}
  0xd3   :  { %72 = dma.vmem_to_hbm [thread:$0]  %s70_s8, 64, %s273_s2, [#allocation4]   ;;  %v61_v17 = vpack.c.bf16 %v60_v16, %v60_v16 }
  0xd4   :  { %s167_s21 = scalar_lea.vmem %s80_s10, 64  ;;  %p172_p11 = scmp.lt.s32.totalorder %s80_s10, %s80_s10 }
  0xd5   :  { %62 = vst.msk [vmem:[#allocation8] sm:$0xf] %vm50_vm1, %v61_v17  ;;  %p168_p10 = scmp.ne.s32.totalorder %s80_s10, %s167_s21  ;;  %p173_p12 = scmp.lt.s32.totalorder %s167_s21, %s167_s21 }
  0xd7   :  { %p174_p13 = por %p173_p12, %p172_p11 }
  0xd9   :  { %p175_p0 = pnand %p174_p13, %p168_p10 }
  0xdb   :  { %178 = shalt.err (!%p175_p0)
}
  0xdc   :  { %s179_s24 = scalar_lea.hbm %s274_s3, 64 }
  0xdd   :  { %p180_p1 = scmp.ne.s32.totalorder %s274_s3, %s179_s24  ;;  %p183_p2 = scmp.lt.u32.totalorder %s179_s24, %s274_s3 }
  0xdf   :  { %p185_p3 = pnand %p183_p2, %p180_p1 }
  0xe1   :  { %188 = shalt.err (!%p185_p3)
}
  0xe2   :  { %82 = dma.vmem_to_hbm [thread:$0]  %s80_s10, 64, %s274_s3, [#allocation9]  }
  0xe3   :  { %193 = dma.done.wait [#allocation4], 64  }
  0xe4   :  { %194 = vsyncadd [#allocation4], 4294967232 }
  0xe5   :  { %195 = dma.done.wait [#allocation9], 64  }
  0xe6   :  { %196 = vsyncadd [#allocation9], 4294967232 }
  0xe7   :  { %89 = vsyncpa [#allocation3], 1 }
  0xe8   :  { %90 = vsyncpa [#allocation6], 1 }
  0xe9   :  { %91 = vsyncpa [#allocation4], 1 }
  0xea   :  { %92 = vsyncpa [#allocation9], 1 }

</bundles_post_ra>
